<compile_context>
chip_gen: v6e
topology: v6e:2x2x1
jax: 0.10.0
libtpu: 0.0.40
codegen_flags: <defaults>
</compile_context>

<pallas_src>
import functools

import jax
import jax.numpy as jnp
from jax import lax
from jax.experimental import pallas as pl
from jax.experimental.pallas import tpu as pltpu

_LANE = 128


def _round_up(x, m):
    return ((x + m - 1) // m) * m


def _num_tensorcores():
    """Best-effort count of TensorCores one Pallas 'parallel' grid can shard over."""
    try:
        info = pltpu.get_tpu_info()
        for attr in ("num_cores", "core_count", "num_tensorcores", "tensorcores_per_chip"):
            n = getattr(info, attr, None)
            if n:
                return max(1, int(n))
    except Exception:
        pass
    try:
        kind = jax.devices()[0].device_kind.lower()
        if any(tag in kind for tag in ("v3", "v4", "v5p", "7")):
            return 2
    except Exception:
        pass
    return 1


def _critic_kernel(x_ref, w1_ref, b1_ref, w2_ref, b2_ref, w3_ref, b3_ref, o_ref):
    # One batch tile; the whole 3-layer MLP stays in VMEM.  The state arrives in
    # its native (tile, D) layout; contracting the feature axis of both operands
    # produces feature-major activations (batch on lanes) with no wrapper transpose.
    x = x_ref[...]                                                        # (tile, D)
    h1 = lax.dot_general(w1_ref[...], x, (((1,), (1,)), ((), ())),
                         preferred_element_type=jnp.float32)              # (fc1, tile)
    h1 = jnp.maximum(h1 + b1_ref[...], 0.0)                               # bias col + ReLU
    # Layer 2 dominates the FLOPs: run it in the weights' dtype (bf16 fast path,
    # f32 exact path), always accumulating in f32.
    h2 = jnp.dot(w2_ref[...], h1.astype(w2_ref.dtype),
                 preferred_element_type=jnp.float32)                      # (fc2, tile)
    h2 = jnp.maximum(h2 + b2_ref[...], 0.0)
    v = jnp.dot(w3_ref[...], h2, preferred_element_type=jnp.float32)      # (1, tile) lane-dense
    o_ref[...] = (v + b3_ref[...]).astype(o_ref.dtype)


@functools.partial(jax.jit, static_argnames=("batch_tile", "use_bf16"))
def critic_forward(state, params, batch_tile=1024, use_bf16=True):
    """state: [B, state_dims] f32 -> value: [B, 1] f32.

    params are in PyTorch layout: W[out, in], b[out, 1].
    """
    w1, b1, w2, b2, w3, b3 = params
    B, D = state.shape
    fc1 = w1.shape[0]
    fc2 = w2.shape[0]

    if use_bf16:
        w2 = w2.astype(jnp.bfloat16)

    # Batch tile: multiple of 128 (lane width), no larger than needed.
    tile = max(_LANE, min(_round_up(batch_tile, _LANE), _round_up(B, _LANE)))
    n_tiles = pl.cdiv(B, tile)

    # Only force extra grid steps when a multi-TensorCore part can actually use
    # them; keep the step count a multiple of the core count for even work split.
    n_cores = _num_tensorcores()
    if n_cores > 1 and n_tiles % n_cores != 0:
        target = _round_up(n_tiles, n_cores)
        tile = max(_LANE, _round_up(pl.cdiv(B, target), _LANE))
        n_tiles = pl.cdiv(B, tile)

    # Rough VMEM footprint: double-buffered x/out tiles, weights (x2 buffers),
    # h1/h2 temporaries.  Only raise the scoped limit if it actually matters.
    w_bytes = w2.dtype.itemsize * fc2 * fc1 + 4 * (fc1 * D + fc1 + fc2 + fc2 + 1)
    est = (2 * tile * D * 4) + (2 * tile * 4) + 2 * w_bytes + 4 * tile * (fc1 + fc2) + (1 << 20)
    cp_kwargs = dict(dimension_semantics=("parallel",))
    if est > 12 * 1024 * 1024:
        cp_kwargs["vmem_limit_bytes"] = int(min(2 * est, 48 * 1024 * 1024))

    # Grid-invariant weight blocks: constant index_map -> no re-DMA across steps.
    const = lambda shape: pl.BlockSpec(shape, lambda i: (0, 0))

    out = pl.pallas_call(
        _critic_kernel,
        out_shape=jax.ShapeDtypeStruct((1, B), jnp.float32),
        grid_spec=pltpu.PrefetchScalarGridSpec(
            num_scalar_prefetch=0,
            grid=(n_tiles,),
            in_specs=[
                pl.BlockSpec((tile, D), lambda i: (i, 0)),  # state tile, native layout
                const((fc1, D)),    # W1
                const((fc1, 1)),    # b1
                const((fc2, fc1)),  # W2 (bf16 on the fast path)
                const((fc2, 1)),    # b2
                const((1, fc2)),    # W3
                const((1, 1)),      # b3
            ],
            out_specs=pl.BlockSpec((1, tile), lambda i: (0, i)),  # lane-dense output row
        ),
        compiler_params=pltpu.CompilerParams(**cp_kwargs),
    )(state, w1, b1, w2, b2, w3, b3)

    return out.reshape(B, 1)


def init_critic_params(key, state_dims, fc1_dims=256, fc2_dims=256):
    """PyTorch Linear-style init (uniform +-1/sqrt(fan_in)); W stored [out, in], b [out, 1]."""
    ks = jax.random.split(key, 6)

    def lin(kw, kb, fan_in, fan_out):
        bound = 1.0 / jnp.sqrt(jnp.float32(fan_in))
        w = jax.random.uniform(kw, (fan_out, fan_in), jnp.float32, -bound, bound)
        b = jax.random.uniform(kb, (fan_out, 1), jnp.float32, -bound, bound)
        return w, b

    w1, b1 = lin(ks[0], ks[1], state_dims, fc1_dims)
    w2, b2 = lin(ks[2], ks[3], fc1_dims, fc2_dims)
    w3, b3 = lin(ks[4], ks[5], fc2_dims, 1)
    return (w1, b1, w2, b2, w3, b3)


def critic_reference(state, params):
    w1, b1, w2, b2, w3, b3 = params
    h1 = jnp.maximum(state @ w1.T + b1.T, 0.0)
    h2 = jnp.maximum(h1 @ w2.T + b2.T, 0.0)
    return h2 @ w3.T + b3.T


if __name__ == "__main__":
    # TODO(synk): Adam optimizer, checkpoint save/load and in-memory param
    # serialization from the original module are host-side features, not kernels.
    key = jax.random.PRNGKey(0)
    k_state, k_state2, k_state3, k_params = jax.random.split(key, 4)

    state_dims = 32
    params = init_critic_params(k_params, state_dims, fc1_dims=256, fc2_dims=256)

    # Small batch, single ragged block, exact f32 path.
    state = jax.random.normal(k_state, (8, state_dims), jnp.float32)
    value = critic_forward(state, params, use_bf16=False)
    jax.block_until_ready(value)
    ref = critic_reference(state, params)
    assert value.shape == (8, 1)
    assert jnp.allclose(value, ref, atol=2e-3, rtol=2e-3)

    # Ragged batch (200 rows in a 256-wide block), bf16 layer-2 fast path.
    state2 = jax.random.normal(k_state2, (200, state_dims), jnp.float32)
    value2 = critic_forward(state2, params)
    jax.block_until_ready(value2)
    ref2 = critic_reference(state2, params)
    assert value2.shape == (200, 1)
    assert jnp.allclose(value2, ref2, atol=2e-2, rtol=2e-2)

    # Multi-step grid: 3 tiles of 128 over 300 rows (exercises the grid-invariant
    # weight blocks and the ragged last block together).
    state3 = jax.random.normal(k_state3, (300, state_dims), jnp.float32)
    value3 = critic_forward(state3, params, batch_tile=128)
    jax.block_until_ready(value3)
    ref3 = critic_reference(state3, params)
    assert value3.shape == (300, 1)
    assert jnp.allclose(value3, ref3, atol=2e-2, rtol=2e-2)

    print("KERNEL_OK")
</pallas_src>

<mosaic_0001>
module attributes {stable_mosaic.version = 11 : i64} {
  func.func @_critic_kernel(%arg0: i32, %arg1: memref<128x32xf32, #tpu.memory_space<vmem>>, %arg2: memref<256x32xf32, #tpu.memory_space<vmem>>, %arg3: memref<256x1xf32, #tpu.memory_space<vmem>>, %arg4: memref<256x256xf32, #tpu.memory_space<vmem>>, %arg5: memref<256x1xf32, #tpu.memory_space<vmem>>, %arg6: memref<1x256xf32, #tpu.memory_space<vmem>>, %arg7: memref<1x1xf32, #tpu.memory_space<vmem>>, %arg8: memref<1x128xf32, #tpu.memory_space<vmem>>) attributes {dimension_semantics = [#tpu.dimension_semantics<parallel>], iteration_bounds = array<i64: 1>, scalar_prefetch = 0 : i64, scratch_operands = 0 : i64, tpu.core_type = #tpu.core_type<tc>, window_params = [{transform_indices = @transform_0, window_bounds = array<i64: 128, 32>}, {pipeline_mode = #tpu.pipeline_mode<synchronous>, transform_indices = @transform_1, window_bounds = array<i64: 256, 32>}, {pipeline_mode = #tpu.pipeline_mode<synchronous>, transform_indices = @transform_2, window_bounds = array<i64: 256, 1>}, {pipeline_mode = #tpu.pipeline_mode<synchronous>, transform_indices = @transform_3, window_bounds = array<i64: 256, 256>}, {pipeline_mode = #tpu.pipeline_mode<synchronous>, transform_indices = @transform_4, window_bounds = array<i64: 256, 1>}, {pipeline_mode = #tpu.pipeline_mode<synchronous>, transform_indices = @transform_5, window_bounds = array<i64: 1, 256>}, {pipeline_mode = #tpu.pipeline_mode<synchronous>, transform_indices = @transform_6, window_bounds = array<i64: 1, 1>}, {transform_indices = @transform_7, window_bounds = array<i64: 1, 128>}]} {
    %c0 = arith.constant 0 : index
    %c0_0 = arith.constant 0 : index
    %0 = vector.load %arg1[%c0, %c0_0] : memref<128x32xf32, #tpu.memory_space<vmem>>, vector<128x32xf32>
    %c0_1 = arith.constant 0 : index
    %c0_2 = arith.constant 0 : index
    %1 = vector.load %arg2[%c0_1, %c0_2] : memref<256x32xf32, #tpu.memory_space<vmem>>, vector<256x32xf32>
    %cst = arith.constant dense<0.000000e+00> : vector<256x128xf32>
    %2 = tpu.matmul %1, %0, %cst {dimension_numbers = #tpu.dot_dimension_numbers<[1], [1], [0], [0], [0, 0, 1, 0], [], []>} : vector<256x32xf32>, vector<128x32xf32>, vector<256x128xf32> -> vector<256x128xf32>
    %c0_3 = arith.constant 0 : index
    %c0_4 = arith.constant 0 : index
    %3 = vector.load %arg3[%c0_3, %c0_4] : memref<256x1xf32, #tpu.memory_space<vmem>>, vector<256x1xf32>
    %4 = vector.broadcast %3 : vector<256x1xf32> to vector<256x128xf32>
    %5 = arith.addf %2, %4 : vector<256x128xf32>
    %cst_5 = arith.constant 0.000000e+00 : f32
    %6 = vector.broadcast %cst_5 : f32 to vector<256x128xf32>
    %7 = arith.maximumf %5, %6 : vector<256x128xf32>
    %c0_6 = arith.constant 0 : index
    %c0_7 = arith.constant 0 : index
    %8 = vector.load %arg4[%c0_6, %c0_7] : memref<256x256xf32, #tpu.memory_space<vmem>>, vector<256x256xf32>
    %cst_8 = arith.constant dense<0.000000e+00> : vector<256x128xf32>
    %9 = tpu.matmul %8, %7, %cst_8 {dimension_numbers = #tpu.dot_dimension_numbers<[1], [0], [0], [1], [0, 0, 1, 1], [], []>} : vector<256x256xf32>, vector<256x128xf32>, vector<256x128xf32> -> vector<256x128xf32>
    %c0_9 = arith.constant 0 : index
    %c0_10 = arith.constant 0 : index
    %10 = vector.load %arg5[%c0_9, %c0_10] : memref<256x1xf32, #tpu.memory_space<vmem>>, vector<256x1xf32>
    %11 = vector.broadcast %10 : vector<256x1xf32> to vector<256x128xf32>
    %12 = arith.addf %9, %11 : vector<256x128xf32>
    %cst_11 = arith.constant 0.000000e+00 : f32
    %13 = vector.broadcast %cst_11 : f32 to vector<256x128xf32>
    %14 = arith.maximumf %12, %13 : vector<256x128xf32>
    %c0_12 = arith.constant 0 : index
    %c0_13 = arith.constant 0 : index
    %15 = vector.load %arg6[%c0_12, %c0_13] : memref<1x256xf32, #tpu.memory_space<vmem>>, vector<1x256xf32>
    %cst_14 = arith.constant dense<0.000000e+00> : vector<1x128xf32>
    %16 = tpu.matmul %15, %14, %cst_14 {dimension_numbers = #tpu.dot_dimension_numbers<[1], [0], [0], [1], [0, 0, 1, 1], [], []>} : vector<1x256xf32>, vector<256x128xf32>, vector<1x128xf32> -> vector<1x128xf32>
    %c0_15 = arith.constant 0 : index
    %c0_16 = arith.constant 0 : index
    %17 = vector.load %arg7[%c0_15, %c0_16] : memref<1x1xf32, #tpu.memory_space<vmem>>, vector<1x1xf32>
    %18 = vector.broadcast %17 : vector<1x1xf32> to vector<1x128xf32>
    %19 = arith.addf %16, %18 : vector<1x128xf32>
    %c0_17 = arith.constant 0 : index
    %c0_18 = arith.constant 0 : index
    %20 = vector.load %arg8[%c0_17, %c0_18] : memref<1x128xf32, #tpu.memory_space<vmem>>, vector<1x128xf32>
    tpu.vector_store %arg8[%c0_17, %c0_18], %19 {strides = array<i32>} : memref<1x128xf32, #tpu.memory_space<vmem>>, vector<1x128xf32>,
    return
  }
  func.func @transform_0(%arg0: i32) -> (i32, i32) {
    %c0_i32 = arith.constant 0 : i32
    %c0_i32_0 = arith.constant 0 : i32
    return %arg0, %c0_i32 : i32, i32
  }
  func.func @transform_1(%arg0: i32) -> (i32, i32) {
    %c0_i32 = arith.constant 0 : i32
    %c0_i32_0 = arith.constant 0 : i32
    %c0_i32_1 = arith.constant 0 : i32
    return %c0_i32, %c0_i32_0 : i32, i32
  }
  func.func @transform_2(%arg0: i32) -> (i32, i32) {
    %c0_i32 = arith.constant 0 : i32
    %c0_i32_0 = arith.constant 0 : i32
    %c0_i32_1 = arith.constant 0 : i32
    return %c0_i32, %c0_i32_0 : i32, i32
  }
  func.func @transform_3(%arg0: i32) -> (i32, i32) {
    %c0_i32 = arith.constant 0 : i32
    %c0_i32_0 = arith.constant 0 : i32
    %c0_i32_1 = arith.constant 0 : i32
    return %c0_i32, %c0_i32_0 : i32, i32
  }
  func.func @transform_4(%arg0: i32) -> (i32, i32) {
    %c0_i32 = arith.constant 0 : i32
    %c0_i32_0 = arith.constant 0 : i32
    %c0_i32_1 = arith.constant 0 : i32
    return %c0_i32, %c0_i32_0 : i32, i32
  }
  func.func @transform_5(%arg0: i32) -> (i32, i32) {
    %c0_i32 = arith.constant 0 : i32
    %c0_i32_0 = arith.constant 0 : i32
    %c0_i32_1 = arith.constant 0 : i32
    return %c0_i32, %c0_i32_0 : i32, i32
  }
  func.func @transform_6(%arg0: i32) -> (i32, i32) {
    %c0_i32 = arith.constant 0 : i32
    %c0_i32_0 = arith.constant 0 : i32
    %c0_i32_1 = arith.constant 0 : i32
    return %c0_i32, %c0_i32_0 : i32, i32
  }
  func.func @transform_7(%arg0: i32) -> (i32, i32) {
    %c0_i32 = arith.constant 0 : i32
    %c0_i32_0 = arith.constant 0 : i32
    return %c0_i32, %arg0 : i32, i32
  }
}

</mosaic_0001>

<bundles_post_ra>
// kernel: critic_forward.1
= control target key start
LH: loop header
LB: loop body
LE: loop exit
PB: predicated region body
PF: predicated region fallthrough
CT: control target
= control target key end

     0   :  { %s2321_s0 = inlined_call_operand.vmem [shape: f32[8,32], index: 0, kind: input, shape index: {}]   ;;  %s2322_s1 = inlined_call_operand.vmem [shape: f32[256,32], index: 1, kind: input, shape index: {}]   ;;  %s2323_s2 = inlined_call_operand.vmem [shape: f32[256,1], index: 2, kind: input, shape index: {}]   ;;  %s2324_s3 = inlined_call_operand.vmem [shape: f32[256,256], index: 3, kind: input, shape index: {}]   ;;  %s2325_s4 = inlined_call_operand.vmem [shape: f32[256,1], index: 4, kind: input, shape index: {}]   ;;  %s2326_s5 = inlined_call_operand.vmem [shape: f32[1,256], index: 5, kind: input, shape index: {}]   ;;  %s2327_s6 = inlined_call_operand.<no memory space> [shape: f32[1,1], index: 6, kind: input, shape index: {}]   ;;  %s2328_s7 = inlined_call_operand.hbm [shape: f32[1,8], index: 7, kind: output, shape index: {}]  }
   0x1   :  { %v12_v0 = vstv %s2327_s6 }
   0x2   :  { %13 = vst [vmem:[#allocation2] sm:$0x1] %v12_v0 }
   0x3   :  { %v44_v1 = vld [vmem:[%s2321_s0 + $0x78] sm:$0xff]  ;;  %vm269_vm0 = vcmask 261120   ;;  %v43_v2 = vld [vmem:[%s2321_s0 + $0x70] sm:$0xff]  ;;  %v1529_v3 = vmov 0   ;;  %v42_v5 = vld [vmem:[%s2321_s0 + $0x68] sm:$0xff] }
   0x4   :  { %1422 = vmatprep.subr.msk.mxu0 %vm269_vm0, %v44_v1  ;;  %1505 = vset.pattern.permute.xlu0 %v1529_v3  ;;  %v92_v4 = vld [vmem:[%s2323_s2 + $0x78] sm:$0xff]  ;;  %v91_v6 = vld [vmem:[%s2323_s2 + $0x70] sm:$0xff]  ;;  %v90_v7 = vld [vmem:[%s2323_s2 + $0x68] sm:$0xff] }
   0x5   :  { %1423 = vmatpush3.xpose.msk.msra.mxu0 %vm269_vm0, %v44_v1  ;;  %1506 = vset.pattern.permute.xlu1 %v1529_v3  ;;  %v89_v8 = vld [vmem:[%s2323_s2 + $0x60] sm:$0xff]  ;;  %v88_v10 = vld [vmem:[%s2323_s2 + $0x58] sm:$0xff]  ;;  %v87_v11 = vld [vmem:[%s2323_s2 + $0x50] sm:$0xff] }
   0x6   :  { %1424 = vmatprep.subr.msk.mxu0 %vm269_vm0, %v43_v2  ;;  %186 = vperm.xlu0 %1505, %v92_v4   ;;  %v41_v9 = vld [vmem:[%s2321_s0 + $0x60] sm:$0xff]  ;;  %v40_v13 = vld [vmem:[%s2321_s0 + $0x58] sm:$0xff]  ;;  %v86_v14 = vld [vmem:[%s2323_s2 + $0x48] sm:$0xff] }
   0x7   :  { %176 = vperm.xlu1 %1506, %v90_v7   ;;  %v45_v12 = vld [vmem:[%s2322_s1] sm:$0xff]  ;;  %v39_v16 = vld [vmem:[%s2321_s0 + $0x50] sm:$0xff]  ;;  %v84_v17 = vld [vmem:[%s2323_s2 + $0x38] sm:$0xff] }
   0x8   :  { %1454 = vmatprep.mubr.msk.f32.mxu0 %vm269_vm0, %v45_v12  ;;  %v85_v15 = vld [vmem:[%s2323_s2 + $0x40] sm:$0xff]  ;;  %v83_v18 = vld [vmem:[%s2323_s2 + $0x30] sm:$0xff]  ;;  %v38_v19 = vld [vmem:[%s2321_s0 + $0x48] sm:$0xff] }
   0x9   :  { %1425 = vmatpush3.xpose.msk.msra.mxu0 %vm269_vm0, %v43_v2  ;;  %v82_v20 = vld [vmem:[%s2323_s2 + $0x28] sm:$0xff]  ;;  %v81_v21 = vld [vmem:[%s2323_s2 + $0x20] sm:$0xff]  ;;  %v80_v23 = vld [vmem:[%s2323_s2 + $0x18] sm:$0xff] }
   0xa   :  { %1426 = vmatprep.subr.msk.mxu0 %vm269_vm0, %v42_v5  ;;  %181 = vperm.xlu0 %1505, %v91_v6   ;;  %v37_v22 = vld [vmem:[%s2321_s0 + $0x40] sm:$0xff]  ;;  %v79_v24 = vld [vmem:[%s2323_s2 + $0x10] sm:$0xff]  ;;  %v36_v25 = vld [vmem:[%s2321_s0 + $0x38] sm:$0xff] }
   0xb   :  { %171 = vperm.xlu1 %1506, %v89_v8   ;;  %v78_v26 = vld [vmem:[%s2323_s2 + $0x8] sm:$0xff]  ;;  %v77_v27 = vld [vmem:[%s2323_s2] sm:$0xff]  ;;  %v35_v28 = vld [vmem:[%s2321_s0 + $0x30] sm:$0xff] }
   0xc   :  { %v108_v29 = vld [vmem:[%s2323_s2 + $0xf8] sm:$0xff]  ;;  %v107_v30 = vld [vmem:[%s2323_s2 + $0xf0] sm:$0xff]  ;;  %v34_v31 = vld [vmem:[%s2321_s0 + $0x28] sm:$0xff] }
   0xd   :  { %1427 = vmatpush3.xpose.msk.msra.mxu0 %vm269_vm0, %v42_v5  ;;  %v106_v32 = vld [vmem:[%s2323_s2 + $0xe8] sm:$0xff] }
   0xe   :  { %1428 = vmatprep.subr.msk.mxu0 %vm269_vm0, %v41_v9  ;;  %166 = vperm.xlu0 %1505, %v88_v10  }
   0xf   :  { %161 = vperm.xlu1 %1506, %v87_v11  }
  0x11   :  { %1429 = vmatpush3.xpose.msk.msra.mxu0 %vm269_vm0, %v41_v9 }
  0x12   :  { %1430 = vmatprep.subr.msk.mxu0 %vm269_vm0, %v40_v13  ;;  %156 = vperm.xlu0 %1505, %v86_v14  }
  0x13   :  { %151 = vperm.xlu1 %1506, %v85_v15  }
  0x15   :  { %1431 = vmatpush3.xpose.msk.msra.mxu0 %vm269_vm0, %v40_v13 }
  0x16   :  { %1432 = vmatprep.subr.msk.mxu0 %vm269_vm0, %v39_v16  ;;  %146 = vperm.xlu0 %1505, %v84_v17  }
  0x17   :  { %141 = vperm.xlu1 %1506, %v83_v18  }
  0x19   :  { %1433 = vmatpush3.xpose.msk.msra.mxu0 %vm269_vm0, %v39_v16 }
  0x1a   :  { %1434 = vmatprep.subr.msk.mxu0 %vm269_vm0, %v38_v19  ;;  %136 = vperm.xlu0 %1505, %v82_v20  }
  0x1b   :  { %131 = vperm.xlu1 %1506, %v81_v21  }
  0x1d   :  { %1435 = vmatpush3.xpose.msk.msra.mxu0 %vm269_vm0, %v38_v19 }
  0x1e   :  { %1436 = vmatprep.subr.msk.mxu0 %vm269_vm0, %v37_v22  ;;  %126 = vperm.xlu0 %1505, %v80_v23  }
  0x1f   :  { %121 = vperm.xlu1 %1506, %v79_v24  }
  0x21   :  { %1437 = vmatpush3.xpose.msk.msra.mxu0 %vm269_vm0, %v37_v22 }
  0x22   :  { %1438 = vmatprep.subr.msk.mxu0 %vm269_vm0, %v36_v25  ;;  %116 = vperm.xlu0 %1505, %v78_v26  }
  0x23   :  { %111 = vperm.xlu1 %1506, %v77_v27  }
  0x25   :  { %1439 = vmatpush3.xpose.msk.msra.mxu0 %vm269_vm0, %v36_v25 }
  0x26   :  { %1440 = vmatprep.subr.msk.mxu0 %vm269_vm0, %v35_v28  ;;  %266 = vperm.xlu0 %1505, %v108_v29  }
  0x27   :  { %261 = vperm.xlu1 %1506, %v107_v30  }
  0x28   :  { %14 = vsyncpa [#allocation4], 0  ;;  %v105_v33 = vld [vmem:[%s2323_s2 + $0xe0] sm:$0xff]  ;;  %v104_v35 = vld [vmem:[%s2323_s2 + $0xd8] sm:$0xff] }
  0x29   :  { %1441 = vmatpush3.xpose.msk.msra.mxu0 %vm269_vm0, %v35_v28  ;;  %v33_v34 = vld [vmem:[%s2321_s0 + $0x20] sm:$0xff]  ;;  %v103_v36 = vld [vmem:[%s2323_s2 + $0xd0] sm:$0xff]  ;;  %v32_v37 = vld [vmem:[%s2321_s0 + $0x18] sm:$0xff] }
  0x2a   :  { %1442 = vmatprep.subr.msk.mxu0 %vm269_vm0, %v34_v31  ;;  %256 = vperm.xlu0 %1505, %v106_v32   ;;  %v102_v38 = vld [vmem:[%s2323_s2 + $0xc8] sm:$0xff]  ;;  %v101_v39 = vld [vmem:[%s2323_s2 + $0xc0] sm:$0xff]  ;;  %v31_v40 = vld [vmem:[%s2321_s0 + $0x10] sm:$0xff] }
  0x2b   :  { %251 = vperm.xlu1 %1506, %v105_v33   ;;  %v100_v41 = vld [vmem:[%s2323_s2 + $0xb8] sm:$0xff]  ;;  %v99_v42 = vld [vmem:[%s2323_s2 + $0xb0] sm:$0xff]  ;;  %v30_v43 = vld [vmem:[%s2321_s0 + $0x8] sm:$0xff] }
  0x2c   :  { %v98_v44 = vld [vmem:[%s2323_s2 + $0xa8] sm:$0xff]  ;;  %v97_v45 = vld [vmem:[%s2323_s2 + $0xa0] sm:$0xff]  ;;  %v96_v47 = vld [vmem:[%s2323_s2 + $0x98] sm:$0xff] }
  0x2d   :  { %1443 = vmatpush3.xpose.msk.msra.mxu0 %vm269_vm0, %v34_v31  ;;  %v29_v46 = vld [vmem:[%s2321_s0] sm:$0xff]  ;;  %v95_v48 = vld [vmem:[%s2323_s2 + $0x90] sm:$0xff]  ;;  %v94_v49 = vld [vmem:[%s2323_s2 + $0x88] sm:$0xff] }
  0x2e   :  { %1444 = vmatprep.subr.msk.mxu0 %vm269_vm0, %v33_v34  ;;  %246 = vperm.xlu0 %1505, %v104_v35   ;;  %v46_v50 = vld [vmem:[%s2322_s1 + $0x8] sm:$0xff]  ;;  %v93_v51 = vld [vmem:[%s2323_s2 + $0x80] sm:$0xff]  ;;  %v47_v52 = vld [vmem:[%s2322_s1 + $0x10] sm:$0xff] }
  0x2f   :  { %241 = vperm.xlu1 %1506, %v103_v36   ;;  %v766_v53 = vld [vmem:[%s2325_s4 + $0xf8] sm:$0xff]  ;;  %v49_v56 = vld [vmem:[%s2322_s1 + $0x20] sm:$0xff]  ;;  %v765_v57 = vld [vmem:[%s2325_s4 + $0xf0] sm:$0xff] }
  0x30   :  { %v48_v54 = vld [vmem:[%s2322_s1 + $0x18] sm:$0xff]  ;;  %v50_v58 = vld [vmem:[%s2322_s1 + $0x28] sm:$0xff]  ;;  %v749_v59 = vld [vmem:[%s2325_s4 + $0x70] sm:$0xff] }
  0x31   :  { %1445 = vmatpush3.xpose.msk.msra.mxu0 %vm269_vm0, %v33_v34  ;;  %v750_v55 = vld [vmem:[%s2325_s4 + $0x78] sm:$0xff]  ;;  %v51_v60 = vld [vmem:[%s2322_s1 + $0x30] sm:$0xff]  ;;  %v764_v61 = vld [vmem:[%s2325_s4 + $0xe8] sm:$0xff] }
  0x32   :  { %1446 = vmatprep.subr.msk.mxu0 %vm269_vm0, %v32_v37  ;;  %236 = vperm.xlu0 %1505, %v102_v38   ;;  %v52_v62 = vld [vmem:[%s2322_s1 + $0x38] sm:$0xff]  ;;  %v748_v63 = vld [vmem:[%s2325_s4 + $0x68] sm:$0xff]  ;;  %v53_v0 = vld [vmem:[%s2322_s1 + $0x40] sm:$0xff] }
  0x33   :  { %231 = vperm.xlu1 %1506, %v101_v39   ;;  %v763_v1 = vld [vmem:[%s2325_s4 + $0xe0] sm:$0xff]  ;;  %v54_v2 = vld [vmem:[%s2322_s1 + $0x48] sm:$0xff]  ;;  %v55_v4 = vld [vmem:[%s2322_s1 + $0x50] sm:$0xff] }
  0x34   :  { %v747_v3 = vld [vmem:[%s2325_s4 + $0x60] sm:$0xff]  ;;  %v762_v5 = vld [vmem:[%s2325_s4 + $0xd8] sm:$0xff]  ;;  %v761_v9 = vld [vmem:[%s2325_s4 + $0xd0] sm:$0xff] }
  0x35   :  { %1447 = vmatpush3.xpose.msk.msra.mxu0 %vm269_vm0, %v32_v37  ;;  %v56_v6 = vld [vmem:[%s2322_s1 + $0x58] sm:$0xff]  ;;  %v57_v8 = vld [vmem:[%s2322_s1 + $0x60] sm:$0xff]  ;;  %v58_v10 = vld [vmem:[%s2322_s1 + $0x68] sm:$0xff] }
  0x36   :  { %1448 = vmatprep.subr.msk.mxu0 %vm269_vm0, %v31_v40  ;;  %226 = vperm.xlu0 %1505, %v100_v41   ;;  %v746_v7 = vld [vmem:[%s2325_s4 + $0x58] sm:$0xff]  ;;  %v745_v11 = vld [vmem:[%s2325_s4 + $0x50] sm:$0xff]  ;;  %v760_v13 = vld [vmem:[%s2325_s4 + $0xc8] sm:$0xff] }
  0x37   :  { %221 = vperm.xlu1 %1506, %v99_v42   ;;  %v59_v12 = vld [vmem:[%s2322_s1 + $0x70] sm:$0xff]  ;;  %v60_v14 = vld [vmem:[%s2322_s1 + $0x78] sm:$0xff]  ;;  %v744_v15 = vld [vmem:[%s2325_s4 + $0x48] sm:$0xff] }
  0x38   :  { %v61_v16 = vld [vmem:[%s2322_s1 + $0x80] sm:$0xff]  ;;  %v62_v18 = vld [vmem:[%s2322_s1 + $0x88] sm:$0xff]  ;;  %v63_v20 = vld [vmem:[%s2322_s1 + $0x90] sm:$0xff] }
  0x39   :  { %1449 = vmatpush3.xpose.msk.msra.mxu0 %vm269_vm0, %v31_v40  ;;  %v759_v17 = vld [vmem:[%s2325_s4 + $0xc0] sm:$0xff]  ;;  %v758_v21 = vld [vmem:[%s2325_s4 + $0xb8] sm:$0xff]  ;;  %v757_v25 = vld [vmem:[%s2325_s4 + $0xb0] sm:$0xff] }
  0x3a   :  { %1450 = vmatprep.subr.msk.mxu0 %vm269_vm0, %v30_v43  ;;  %216 = vperm.xlu0 %1505, %v98_v44   ;;  %v743_v19 = vld [vmem:[%s2325_s4 + $0x40] sm:$0xff]  ;;  %v64_v22 = vld [vmem:[%s2322_s1 + $0x98] sm:$0xff]  ;;  %v66_v26 = vld [vmem:[%s2322_s1 + $0xa8] sm:$0xff] }
  0x3b   :  { %211 = vperm.xlu1 %1506, %v97_v45   ;;  %v742_v23 = vld [vmem:[%s2325_s4 + $0x38] sm:$0xff]  ;;  %v65_v24 = vld [vmem:[%s2322_s1 + $0xa0] sm:$0xff]  ;;  %v741_v27 = vld [vmem:[%s2325_s4 + $0x30] sm:$0xff] }
  0x3c   :  { %v67_v28 = vld [vmem:[%s2322_s1 + $0xb0] sm:$0xff]  ;;  %v756_v29 = vld [vmem:[%s2325_s4 + $0xa8] sm:$0xff]  ;;  %v68_v30 = vld [vmem:[%s2322_s1 + $0xb8] sm:$0xff] }
  0x3d   :  { %1451 = vmatpush3.xpose.msk.msra.mxu0 %vm269_vm0, %v30_v43  ;;  %v740_v31 = vld [vmem:[%s2325_s4 + $0x28] sm:$0xff]  ;;  %v69_v32 = vld [vmem:[%s2322_s1 + $0xc0] sm:$0xff]  ;;  %v71_v36 = vld [vmem:[%s2322_s1 + $0xd0] sm:$0xff] }
  0x3e   :  { %1452 = vmatprep.subr.msk.mxu0 %vm269_vm0, %v29_v46  ;;  %206 = vperm.xlu0 %1505, %v96_v47   ;;  %v755_v33 = vld [vmem:[%s2325_s4 + $0xa0] sm:$0xff]  ;;  %v70_v34 = vld [vmem:[%s2322_s1 + $0xc8] sm:$0xff]  ;;  %v754_v37 = vld [vmem:[%s2325_s4 + $0x98] sm:$0xff] }
  0x3f   :  { %201 = vperm.xlu1 %1506, %v95_v48   ;;  %v739_v35 = vld [vmem:[%s2325_s4 + $0x20] sm:$0xff]  ;;  %v72_v38 = vld [vmem:[%s2322_s1 + $0xd8] sm:$0xff]  ;;  %v753_v41 = vld [vmem:[%s2325_s4 + $0x90] sm:$0xff] }
  0x40   :  { %v738_v39 = vld [vmem:[%s2325_s4 + $0x18] sm:$0xff]  ;;  %v73_v40 = vld [vmem:[%s2322_s1 + $0xe0] sm:$0xff]  ;;  %v74_v42 = vld [vmem:[%s2322_s1 + $0xe8] sm:$0xff] }
  0x41   :  { %1453 = vmatpush3.xpose.msk.msra.mxu0 %vm269_vm0, %v29_v46  ;;  %v737_v43 = vld [vmem:[%s2325_s4 + $0x10] sm:$0xff]  ;;  %v752_v45 = vld [vmem:[%s2325_s4 + $0x88] sm:$0xff]  ;;  %v76_v46 = vld [vmem:[%s2322_s1 + $0xf8] sm:$0xff] }
  0x42   :  { %196 = vperm.xlu0 %1505, %v94_v49   ;;  %v75_v44 = vld [vmem:[%s2322_s1 + $0xf0] sm:$0xff]  ;;  %v736_v47 = vld [vmem:[%s2325_s4 + $0x8] sm:$0xff]  ;;  %v751_v48 = vld [vmem:[%s2325_s4 + $0x80] sm:$0xff] }
  0x43   :  { %191 = vperm.xlu1 %1506, %v93_v51   ;;  %v735_v49 = vld [vmem:[%s2325_s4] sm:$0xff]  ;;  %v1530_v51 = vmov 0.0  }
  0x44   :  { %1455 = vmatmul.mubr.msk.f32.vlgmr.msra.gmra.mxu0 %vm269_vm0, %v46_v50  ;;  %v1185_v50 = vld [vmem:[#allocation2] sm:$0x1]  ;;  %927 = vmatprep.subr.mxu1 %v1530_v51 }
  0x45   :  { %1457 = vmatprep.mubr.msk.f32.mxu0 %vm269_vm0, %v47_v52  ;;  %v672_v52 = vld [vmem:[%s2324_s3 + $0x8] sm:$0xff] }
  0x46   :  { %924 = vperm.xlu0 %1505, %v766_v53   ;;  %991 = vmatprep.mubr.f32.mxu1 %v672_v52 }
  0x47   :  { %844 = vperm.xlu1 %1506, %v750_v55  }
  0x48   :  { %1458 = vmatmul.mubr.msk.f32.gmra.mxu0 %vm269_vm0, %v48_v54 }
  0x49   :  { %1460 = vmatprep.mubr.msk.f32.mxu0 %vm269_vm0, %v49_v56 }
  0x4a   :  { %919 = vperm.xlu0 %1505, %v765_v57  }
  0x4b   :  { %839 = vperm.xlu1 %1506, %v749_v59  }
  0x4c   :  { %1461 = vmatmul.mubr.msk.f32.gmra.mxu0 %vm269_vm0, %v50_v58 }
  0x4d   :  { %1463 = vmatprep.mubr.msk.f32.mxu0 %vm269_vm0, %v51_v60 }
  0x4e   :  { %914 = vperm.xlu0 %1505, %v764_v61  }
  0x4f   :  { %834 = vperm.xlu1 %1506, %v748_v63  }
  0x50   :  { %1464 = vmatmul.mubr.msk.f32.gmra.mxu0 %vm269_vm0, %v52_v62 }
  0x51   :  { %1466 = vmatprep.mubr.msk.f32.mxu0 %vm269_vm0, %v53_v0 }
  0x52   :  { %909 = vperm.xlu0 %1505, %v763_v1  }
  0x53   :  { %829 = vperm.xlu1 %1506, %v747_v3  }
  0x54   :  { %1467 = vmatmul.mubr.msk.f32.gmra.mxu0 %vm269_vm0, %v54_v2 }
  0x55   :  { %1469 = vmatprep.mubr.msk.f32.mxu0 %vm269_vm0, %v55_v4 }
  0x56   :  { %904 = vperm.xlu0 %1505, %v762_v5  }
  0x57   :  { %824 = vperm.xlu1 %1506, %v746_v7  }
  0x58   :  { %1470 = vmatmul.mubr.msk.f32.gmra.mxu0 %vm269_vm0, %v56_v6 }
  0x59   :  { %1472 = vmatprep.mubr.msk.f32.mxu0 %vm269_vm0, %v57_v8 }
  0x5a   :  { %899 = vperm.xlu0 %1505, %v761_v9  }
  0x5b   :  { %819 = vperm.xlu1 %1506, %v745_v11  }
  0x5c   :  { %1473 = vmatmul.mubr.msk.f32.gmra.mxu0 %vm269_vm0, %v58_v10 }
  0x5d   :  { %1475 = vmatprep.mubr.msk.f32.mxu0 %vm269_vm0, %v59_v12 }
  0x5e   :  { %894 = vperm.xlu0 %1505, %v760_v13  }
  0x5f   :  { %814 = vperm.xlu1 %1506, %v744_v15  }
  0x60   :  { %1476 = vmatmul.mubr.msk.f32.gmra.mxu0 %vm269_vm0, %v60_v14 }
  0x61   :  { %1478 = vmatprep.mubr.msk.f32.mxu0 %vm269_vm0, %v61_v16 }
  0x62   :  { %889 = vperm.xlu0 %1505, %v759_v17  }
  0x63   :  { %809 = vperm.xlu1 %1506, %v743_v19  }
  0x64   :  { %1479 = vmatmul.mubr.msk.f32.gmra.mxu0 %vm269_vm0, %v62_v18 }
  0x65   :  { %1481 = vmatprep.mubr.msk.f32.mxu0 %vm269_vm0, %v63_v20 }
  0x66   :  { %884 = vperm.xlu0 %1505, %v758_v21  }
  0x67   :  { %804 = vperm.xlu1 %1506, %v742_v23  }
  0x68   :  { %1482 = vmatmul.mubr.msk.f32.gmra.mxu0 %vm269_vm0, %v64_v22 }
  0x69   :  { %1484 = vmatprep.mubr.msk.f32.mxu0 %vm269_vm0, %v65_v24 }
  0x6a   :  { %879 = vperm.xlu0 %1505, %v757_v25  }
  0x6b   :  { %799 = vperm.xlu1 %1506, %v741_v27  }
  0x6c   :  { %1485 = vmatmul.mubr.msk.f32.gmra.mxu0 %vm269_vm0, %v66_v26 }
  0x6d   :  { %1487 = vmatprep.mubr.msk.f32.mxu0 %vm269_vm0, %v67_v28 }
  0x6e   :  { %874 = vperm.xlu0 %1505, %v756_v29  }
  0x6f   :  { %794 = vperm.xlu1 %1506, %v740_v31  }
  0x70   :  { %1488 = vmatmul.mubr.msk.f32.gmra.mxu0 %vm269_vm0, %v68_v30 }
  0x71   :  { %1490 = vmatprep.mubr.msk.f32.mxu0 %vm269_vm0, %v69_v32 }
  0x72   :  { %869 = vperm.xlu0 %1505, %v755_v33  }
  0x73   :  { %789 = vperm.xlu1 %1506, %v739_v35  }
  0x74   :  { %1491 = vmatmul.mubr.msk.f32.gmra.mxu0 %vm269_vm0, %v70_v34 }
  0x75   :  { %1493 = vmatprep.mubr.msk.f32.mxu0 %vm269_vm0, %v71_v36 }
  0x76   :  { %864 = vperm.xlu0 %1505, %v754_v37  }
  0x77   :  { %784 = vperm.xlu1 %1506, %v738_v39  }
  0x78   :  { %1494 = vmatmul.mubr.msk.f32.gmra.mxu0 %vm269_vm0, %v72_v38 }
  0x79   :  { %1496 = vmatprep.mubr.msk.f32.mxu0 %vm269_vm0, %v73_v40 }
  0x7a   :  { %859 = vperm.xlu0 %1505, %v753_v41  }
  0x7b   :  { %779 = vperm.xlu1 %1506, %v737_v43  }
  0x7c   :  { %1497 = vmatmul.mubr.msk.f32.gmra.mxu0 %vm269_vm0, %v74_v42 }
  0x7d   :  { %1499 = vmatprep.mubr.msk.f32.mxu0 %vm269_vm0, %v75_v44 }
  0x7e   :  { %854 = vperm.xlu0 %1505, %v752_v45  }
  0x7f   :  { %774 = vperm.xlu1 %1506, %v736_v47  }
  0x80   :  { %1500 = vmatmul.mubr.msk.f32.gmra.mxu0 %vm269_vm0, %v76_v46 }
  0x81   :  { %v187_v53 = vpop.permute.xlu0 %186 }
  0x82   :  { %849 = vperm.xlu0 %1505, %v751_v48   ;;  %v177_v54 = vpop.permute.xlu1 %176 }
  0x83   :  { %769 = vperm.xlu1 %1506, %v735_v49  }
  0x85   :  { %v182_v56 = vpop.permute.xlu0 %181 }
  0x86   :  { %1188 = vperm.xlu0 %1505, %v1185_v50   ;;  %v172_v58 = vpop.permute.xlu1 %171 }
  0x89   :  { %v167_v61 = vpop.permute.xlu0 %166 }
  0x8a   :  { %v162_v63 = vpop.permute.xlu1 %161 }
  0x8d   :  { %v157_v2 = vpop.permute.xlu0 %156 }
  0x8e   :  { %v152_v4 = vpop.permute.xlu1 %151 }
  0x91   :  { %v147_v7 = vpop.permute.xlu0 %146 }
  0x92   :  { %v142_v9 = vpop.permute.xlu1 %141 }
  0x95   :  { %v137_v12 = vpop.permute.xlu0 %136 }
  0x96   :  { %v132_v14 = vpop.permute.xlu1 %131 }
  0x99   :  { %v127_v21 = vpop.permute.xlu0 %126 }
  0x9a   :  { %v122_v25 = vpop.permute.xlu1 %121 }
  0x9d   :  { %v117_v32 = vpop.permute.xlu0 %116 }
  0x9e   :  { %v112_v36 = vpop.permute.xlu1 %111 }
  0xa1   :  { %v267_v43 = vpop.permute.xlu0 %266 }
  0xa2   :  { %v262_v47 = vpop.permute.xlu1 %261 }
 0x104   :  { %v1979_v55 = vpop.f32.mrf.mxu0 }
 0x106   :  { %v1981_v57 = vpop.f32.mrf.mxu0 }
 0x108   :  { %v1983_v59 = vpop.f32.mrf.mxu0 }
 0x10a   :  { %v1985_v60 = vpop.f32.mrf.mxu0 }
 0x10c   :  { %v1987_v62 = vpop.f32.mrf.mxu0 }
 0x10d   :  { %v506_v49 = vadd.f32 %v1987_v62, %v137_v12  ;;  %v491_v62 = vadd.f32 %v1985_v60, %v122_v25 }
 0x10e   :  { %v1989_v0 = vpop.f32.mrf.mxu0 }
 0x110   :  { %v1465_v1 = vpop.f32.mrf.mxu0 }
 0x111   :  { %v516_v41 = vadd.f32 %v1465_v1, %v147_v7  ;;  %v252_v1 = vpop.permute.xlu1 %251 }
 0x112   :  { %v510_v3 = vpop.f32.mrf.mxu0 }
 0x113   :  { %v511_v45 = vadd.f32 %v510_v3, %v142_v9  ;;  %v646_v50 = vmax.f32 %v516_v41, 0.0 }
 0x114   :  { %v1468_v5 = vpop.f32.mrf.mxu0 }
 0x115   :  { %v526_v34 = vadd.f32 %v1468_v5, %v157_v2  ;;  %v242_v9 = vpop.permute.xlu1 %241 }
 0x116   :  { %v520_v6 = vpop.f32.mrf.mxu0 }
 0x117   :  { %v521_v38 = vadd.f32 %v520_v6, %v152_v4  ;;  %v648_v42 = vmax.f32 %v526_v34, 0.0 }
 0x118   :  { %v1471_v8 = vpop.f32.mrf.mxu0 }
 0x119   :  { %v536_v27 = vadd.f32 %v1471_v8, %v167_v61  ;;  %v647_v46 = vmax.f32 %v521_v38, 0.0  ;;  %v496_v61 = vadd.f32 %v1983_v59, %v127_v21  ;;  %v481_v59 = vadd.f32 %v1981_v57, %v112_v36 }
 0x11a   :  { %v530_v10 = vpop.f32.mrf.mxu0  ;;  %v641_v8 = vmax.f32 %v491_v62, 0.0  ;;  %v680_v62 = vld [vmem:[%s2324_s3 + $0x48] sm:$0xff] }
 0x11b   :  { %v531_v30 = vadd.f32 %v530_v10, %v162_v63  ;;  %v650_v35 = vmax.f32 %v536_v27, 0.0  ;;  %v644_v63 = vmax.f32 %v506_v49, 0.0  ;;  %v642_v5 = vmax.f32 %v496_v61, 0.0  ;;  %v673_v61 = vld [vmem:[%s2324_s3 + $0x10] sm:$0xff] }
 0x11c   :  { %v1474_v11 = vpop.f32.mrf.mxu0 }
 0x11d   :  { %v546_v18 = vadd.f32 %v1474_v11, %v177_v54  ;;  %v649_v39 = vmax.f32 %v531_v30, 0.0  ;;  %v645_v54 = vmax.f32 %v511_v45, 0.0 }
 0x11e   :  { %v540_v13 = vpop.f32.mrf.mxu0 }
 0x11f   :  { %v541_v23 = vadd.f32 %v540_v13, %v172_v58  ;;  %v652_v28 = vmax.f32 %v546_v18, 0.0 }
 0x120   :  { %v1477_v15 = vpop.f32.mrf.mxu0 }
 0x121   :  { %v556_v16 = vadd.f32 %v1477_v15, %v187_v53  ;;  %v651_v31 = vmax.f32 %v541_v23, 0.0  ;;  %v501_v53 = vadd.f32 %v1989_v0, %v132_v14  ;;  %v486_v0 = vadd.f32 %v1979_v55, %v117_v32 }
 0x122   :  { %v550_v17 = vpop.f32.mrf.mxu0  ;;  %v639_v55 = vmax.f32 %v481_v59, 0.0  ;;  %v685_v59 = vld [vmem:[%s2324_s3 + $0x70] sm:$0xff] }
 0x123   :  { %v654_v19 = vmax.f32 %v556_v16, 0.0  ;;  %v551_v20 = vadd.f32 %v550_v17, %v182_v56  ;;  %v257_v56 = vpop.permute.xlu0 %256  ;;  %v643_v3 = vmax.f32 %v501_v53, 0.0  ;;  %v640_v60 = vmax.f32 %v486_v0, 0.0  ;;  %v232_v17 = vpop.permute.xlu1 %231  ;;  %v681_v0 = vld [vmem:[%s2324_s3 + $0x50] sm:$0xff] }
 0x124   :  { %v1991_v22 = vpop.f32.mrf.mxu0 }
 0x125   :  { %v653_v24 = vmax.f32 %v551_v20, 0.0  ;;  %928 = vmatpush1.msra.mxu1 %v654_v19 }
 0x126   :  { %v1993_v26 = vpop.f32.mrf.mxu0  ;;  %929 = vmatprep.subr.mxu1 %v1530_v51 }
 0x127   :  { %930 = vmatpush1.msra.mxu1 %v653_v24  ;;  %v247_v6 = vpop.permute.xlu0 %246  ;;  %v222_v27 = vpop.permute.xlu1 %221 }
 0x128   :  { %v1996_v29 = vpop.f32.mrf.mxu0  ;;  %931 = vmatprep.subr.mxu1 %v1530_v51 }
 0x129   :  { %932 = vmatpush1.msra.mxu1 %v652_v28 }
 0x12a   :  { %v1999_v33 = vpop.f32.mrf.mxu0  ;;  %933 = vmatprep.subr.mxu1 %v1530_v51 }
 0x12b   :  { %934 = vmatpush1.msra.mxu1 %v651_v31  ;;  %v237_v13 = vpop.permute.xlu0 %236  ;;  %v212_v38 = vpop.permute.xlu1 %211 }
 0x12c   :  { %v2002_v37 = vpop.f32.mrf.mxu0  ;;  %935 = vmatprep.subr.mxu1 %v1530_v51 }
 0x12d   :  { %936 = vmatpush1.msra.mxu1 %v650_v35 }
 0x12e   :  { %v2005_v40 = vpop.f32.mrf.mxu0  ;;  %937 = vmatprep.subr.mxu1 %v1530_v51 }
 0x12f   :  { %938 = vmatpush1.msra.mxu1 %v649_v39  ;;  %v227_v23 = vpop.permute.xlu0 %226 }
 0x130   :  { %v2008_v44 = vpop.f32.mrf.mxu0  ;;  %939 = vmatprep.subr.mxu1 %v1530_v51 }
 0x131   :  { %940 = vmatpush1.msra.mxu1 %v648_v42  ;;  %v596_v35 = vadd.f32 %v2008_v44, %v227_v23  ;;  %v581_v44 = vadd.f32 %v2005_v40, %v212_v38  ;;  %v703_v23 = vld [vmem:[%s2324_s3 + $0x100] sm:$0xff]  ;;  %v716_v38 = vld [vmem:[%s2324_s3 + $0x168] sm:$0xff] }
 0x132   :  { %v2011_v48 = vpop.f32.mrf.mxu0  ;;  %941 = vmatprep.subr.mxu1 %v1530_v51 }
 0x133   :  { %942 = vmatpush1.msra.mxu1 %v647_v46  ;;  %v217_v34 = vpop.permute.xlu0 %216  ;;  %v591_v39 = vadd.f32 %v2011_v48, %v222_v27  ;;  %v708_v27 = vld [vmem:[%s2324_s3 + $0x128] sm:$0xff] }
 0x134   :  { %v1492_v52 = vpop.f32.mrf.mxu0  ;;  %943 = vmatprep.subr.mxu1 %v1530_v51  ;;  %v586_v42 = vadd.f32 %v2002_v37, %v217_v34  ;;  %v711_v34 = vld [vmem:[%s2324_s3 + $0x140] sm:$0xff] }
 0x135   :  { %944 = vmatpush1.msra.mxu1 %v646_v50  ;;  %v606_v28 = vadd.f32 %v1492_v52, %v237_v13  ;;  %v661_v46 = vmax.f32 %v591_v39, 0.0  ;;  %v659_v50 = vmax.f32 %v581_v44, 0.0  ;;  %v693_v13 = vld [vmem:[%s2324_s3 + $0xb0] sm:$0xff]  ;;  %v715_v39 = vld [vmem:[%s2324_s3 + $0x160] sm:$0xff]  ;;  %v722_v44 = vld [vmem:[%s2324_s3 + $0x198] sm:$0xff] }
 0x136   :  { %v600_v58 = vpop.f32.mrf.mxu0  ;;  %945 = vmatprep.subr.mxu1 %v1530_v51  ;;  %v660_v49 = vmax.f32 %v586_v42, 0.0  ;;  %v717_v42 = vld [vmem:[%s2324_s3 + $0x170] sm:$0xff] }
 0x137   :  { %946 = vmatpush1.msra.mxu1 %v645_v54  ;;  %v601_v31 = vadd.f32 %v600_v58, %v232_v17  ;;  %v664_v36 = vmax.f32 %v606_v28, 0.0  ;;  %v207_v45 = vpop.permute.xlu0 %206  ;;  %v700_v17 = vld [vmem:[%s2324_s3 + $0xe8] sm:$0xff]  ;;  %v707_v28 = vld [vmem:[%s2324_s3 + $0x120] sm:$0xff] }
 0x138   :  { %v1495_v2 = vpop.f32.mrf.mxu0  ;;  %947 = vmatprep.subr.mxu1 %v1530_v51  ;;  %v576_v48 = vadd.f32 %v1996_v29, %v207_v45  ;;  %v719_v45 = vld [vmem:[%s2324_s3 + $0x180] sm:$0xff] }
 0x139   :  { %948 = vmatpush1.msra.mxu1 %v644_v63  ;;  %v616_v20 = vadd.f32 %v1495_v2, %v247_v6  ;;  %v663_v41 = vmax.f32 %v601_v31, 0.0  ;;  %v676_v63 = vld [vmem:[%s2324_s3 + $0x28] sm:$0xff]  ;;  %v677_v2 = vld [vmem:[%s2324_s3 + $0x30] sm:$0xff]  ;;  %v683_v6 = vld [vmem:[%s2324_s3 + $0x60] sm:$0xff] }
 0x13a   :  { %v610_v4 = vpop.f32.mrf.mxu0  ;;  %949 = vmatprep.subr.mxu1 %v1530_v51  ;;  %v658_v53 = vmax.f32 %v576_v48, 0.0  ;;  %v709_v31 = vld [vmem:[%s2324_s3 + $0x130] sm:$0xff]  ;;  %v723_v48 = vld [vmem:[%s2324_s3 + $0x1a0] sm:$0xff] }
 0x13b   :  { %950 = vmatpush1.msra.mxu1 %v643_v3  ;;  %v611_v24 = vadd.f32 %v610_v4, %v242_v9  ;;  %v666_v30 = vmax.f32 %v616_v20, 0.0  ;;  %v197_v52 = vpop.permute.xlu0 %196  ;;  %v679_v3 = vld [vmem:[%s2324_s3 + $0x40] sm:$0xff]  ;;  %v682_v4 = vld [vmem:[%s2324_s3 + $0x58] sm:$0xff]  ;;  %v701_v20 = vld [vmem:[%s2324_s3 + $0xf0] sm:$0xff] }
 0x13c   :  { %v1498_v7 = vpop.f32.mrf.mxu0  ;;  %951 = vmatprep.subr.mxu1 %v1530_v51  ;;  %v566_v40 = vadd.f32 %v1991_v22, %v197_v52  ;;  %v671_v22 = vld [vmem:[%s2324_s3] sm:$0xff] }
 0x13d   :  { %952 = vmatpush1.msra.mxu1 %v642_v5  ;;  %v626_v15 = vadd.f32 %v1498_v7, %v257_v56  ;;  %v665_v32 = vmax.f32 %v611_v24, 0.0  ;;  %v684_v5 = vld [vmem:[%s2324_s3 + $0x68] sm:$0xff]  ;;  %v686_v7 = vld [vmem:[%s2324_s3 + $0x78] sm:$0xff]  ;;  %v687_v9 = vld [vmem:[%s2324_s3 + $0x80] sm:$0xff] }
 0x13e   :  { %v620_v10 = vpop.f32.mrf.mxu0  ;;  %953 = vmatprep.subr.mxu1 %v1530_v51  ;;  %v656_v58 = vmax.f32 %v566_v40, 0.0  ;;  %v706_v24 = vld [vmem:[%s2324_s3 + $0x118] sm:$0xff]  ;;  %v727_v52 = vld [vmem:[%s2324_s3 + $0x1c0] sm:$0xff] }
 0x13f   :  { %954 = vmatpush1.msra.mxu1 %v641_v8  ;;  %v621_v18 = vadd.f32 %v620_v10, %v252_v1  ;;  %v668_v21 = vmax.f32 %v626_v15, 0.0  ;;  %v678_v1 = vld [vmem:[%s2324_s3 + $0x38] sm:$0xff]  ;;  %v688_v8 = vld [vmem:[%s2324_s3 + $0x88] sm:$0xff]  ;;  %v695_v15 = vld [vmem:[%s2324_s3 + $0xc0] sm:$0xff] }
 0x140   :  { %v1501_v11 = vpop.f32.mrf.mxu0  ;;  %955 = vmatprep.subr.mxu1 %v1530_v51  ;;  %v690_v10 = vld [vmem:[%s2324_s3 + $0x98] sm:$0xff] }
 0x141   :  { %v636_v12 = vadd.f32 %v1501_v11, %v267_v43  ;;  %956 = vmatpush1.msra.mxu1 %v640_v60  ;;  %v667_v25 = vmax.f32 %v621_v18, 0.0  ;;  %v662_v43 = vmax.f32 %v596_v35, 0.0  ;;  %v689_v60 = vld [vmem:[%s2324_s3 + $0x90] sm:$0xff]  ;;  %v692_v11 = vld [vmem:[%s2324_s3 + $0xa8] sm:$0xff]  ;;  %v699_v18 = vld [vmem:[%s2324_s3 + $0xe0] sm:$0xff] }
 0x142   :  { %v630_v14 = vpop.f32.mrf.mxu0  ;;  %957 = vmatprep.subr.mxu1 %v1530_v51  ;;  %v714_v35 = vld [vmem:[%s2324_s3 + $0x158] sm:$0xff] }
 0x143   :  { %v670_v57 = vmax.f32 %v636_v12, 0.0  ;;  %v631_v16 = vadd.f32 %v630_v14, %v262_v47  ;;  %958 = vmatpush1.msra.mxu1 %v639_v55  ;;  %v202_v47 = vpop.permute.xlu1 %201  ;;  %v691_v55 = vld [vmem:[%s2324_s3 + $0xa0] sm:$0xff]  ;;  %v694_v12 = vld [vmem:[%s2324_s3 + $0xb8] sm:$0xff]  ;;  %v696_v14 = vld [vmem:[%s2324_s3 + $0xc8] sm:$0xff] }
 0x144   :  { %959 = vmatprep.subr.mxu1 %v1530_v51  ;;  %v571_v37 = vadd.f32 %v1999_v33, %v202_v47  ;;  %v724_v47 = vld [vmem:[%s2324_s3 + $0x1a8] sm:$0xff]  ;;  %v730_v40 = vld [vmem:[%s2324_s3 + $0x1d8] sm:$0xff] }
 0x145   :  { %v669_v19 = vmax.f32 %v631_v16, 0.0  ;;  %960 = vmatpush2.msra.mxu1 %v670_v57  ;;  %v698_v57 = vld [vmem:[%s2324_s3 + $0xd8] sm:$0xff]  ;;  %v697_v16 = vld [vmem:[%s2324_s3 + $0xd0] sm:$0xff] }
 0x146   :  { %961 = vmatprep.subr.mxu1 %v1530_v51  ;;  %v657_v56 = vmax.f32 %v571_v37, 0.0  ;;  %v725_v37 = vld [vmem:[%s2324_s3 + $0x1b0] sm:$0xff] }
 0x147   :  { %962 = vmatpush2.msra.mxu1 %v669_v19  ;;  %v192_v54 = vpop.permute.xlu1 %191  ;;  %v702_v19 = vld [vmem:[%s2324_s3 + $0xf8] sm:$0xff] }
 0x148   :  { %963 = vmatprep.subr.mxu1 %v1530_v51  ;;  %v561_v29 = vadd.f32 %v1993_v26, %v192_v54  ;;  %v674_v26 = vld [vmem:[%s2324_s3 + $0x18] sm:$0xff]  ;;  %v732_v54 = vld [vmem:[%s2324_s3 + $0x1e8] sm:$0xff] }
 0x149   :  { %964 = vmatpush2.msra.mxu1 %v668_v21  ;;  %v704_v21 = vld [vmem:[%s2324_s3 + $0x108] sm:$0xff] }
 0x14a   :  { %965 = vmatprep.subr.mxu1 %v1530_v51  ;;  %v655_v33 = vmax.f32 %v561_v29, 0.0  ;;  %v731_v29 = vld [vmem:[%s2324_s3 + $0x1e0] sm:$0xff] }
 0x14b   :  { %966 = vmatpush2.msra.mxu1 %v667_v25  ;;  %v705_v25 = vld [vmem:[%s2324_s3 + $0x110] sm:$0xff] }
 0x14c   :  { %967 = vmatprep.subr.mxu1 %v1530_v51 }
 0x14d   :  { %968 = vmatpush2.msra.mxu1 %v666_v30  ;;  %v710_v30 = vld [vmem:[%s2324_s3 + $0x138] sm:$0xff] }
 0x14e   :  { %969 = vmatprep.subr.mxu1 %v1530_v51 }
 0x14f   :  { %970 = vmatpush2.msra.mxu1 %v665_v32  ;;  %v712_v32 = vld [vmem:[%s2324_s3 + $0x148] sm:$0xff] }
 0x150   :  { %971 = vmatprep.subr.mxu1 %v1530_v51 }
 0x151   :  { %972 = vmatpush2.msra.mxu1 %v664_v36  ;;  %v713_v36 = vld [vmem:[%s2324_s3 + $0x150] sm:$0xff] }
 0x152   :  { %973 = vmatprep.subr.mxu1 %v1530_v51 }
 0x153   :  { %974 = vmatpush2.msra.mxu1 %v663_v41  ;;  %v718_v41 = vld [vmem:[%s2324_s3 + $0x178] sm:$0xff] }
 0x154   :  { %975 = vmatprep.subr.mxu1 %v1530_v51 }
 0x155   :  { %976 = vmatpush2.msra.mxu1 %v662_v43  ;;  %v720_v43 = vld [vmem:[%s2324_s3 + $0x188] sm:$0xff] }
 0x156   :  { %977 = vmatprep.subr.mxu1 %v1530_v51 }
 0x157   :  { %978 = vmatpush2.msra.mxu1 %v661_v46  ;;  %v721_v46 = vld [vmem:[%s2324_s3 + $0x190] sm:$0xff] }
 0x158   :  { %979 = vmatprep.subr.mxu1 %v1530_v51 }
 0x159   :  { %980 = vmatpush2.msra.mxu1 %v660_v49  ;;  %v726_v49 = vld [vmem:[%s2324_s3 + $0x1b8] sm:$0xff] }
 0x15a   :  { %981 = vmatprep.subr.mxu1 %v1530_v51 }
 0x15b   :  { %982 = vmatpush2.msra.mxu1 %v659_v50  ;;  %v728_v50 = vld [vmem:[%s2324_s3 + $0x1c8] sm:$0xff] }
 0x15c   :  { %983 = vmatprep.subr.mxu1 %v1530_v51 }
 0x15d   :  { %984 = vmatpush2.msra.mxu1 %v658_v53  ;;  %v729_v53 = vld [vmem:[%s2324_s3 + $0x1d0] sm:$0xff] }
 0x15e   :  { %985 = vmatprep.subr.mxu1 %v1530_v51 }
 0x15f   :  { %986 = vmatpush2.msra.mxu1 %v657_v56  ;;  %v734_v56 = vld [vmem:[%s2324_s3 + $0x1f8] sm:$0xff] }
 0x160   :  { %987 = vmatprep.subr.mxu1 %v1530_v51 }
 0x161   :  { %988 = vmatpush2.msra.mxu1 %v656_v58  ;;  %v733_v58 = vld [vmem:[%s2324_s3 + $0x1f0] sm:$0xff] }
 0x162   :  { %989 = vmatprep.subr.mxu1 %v1530_v51  ;;  %v675_v51 = vld [vmem:[%s2324_s3 + $0x20] sm:$0xff] }
 0x163   :  { %990 = vmatpush2.msra.mxu1 %v655_v33 }
 0x164   :  { %992 = vmatmul.mubr.f32.vlgmr.msra.gmra.mxu1 %v671_v22 }
 0x165   :  { %996 = vmatprep.mubr.f32.mxu1 %v674_v26 }
 0x168   :  { %997 = vmatmul.mubr.f32.gmra.mxu1 %v673_v61 }
 0x169   :  { %1001 = vmatprep.mubr.f32.mxu1 %v676_v63 }
 0x16c   :  { %1002 = vmatmul.mubr.f32.gmra.mxu1 %v675_v51 }
 0x16d   :  { %1006 = vmatprep.mubr.f32.mxu1 %v678_v1 }
 0x170   :  { %1007 = vmatmul.mubr.f32.gmra.mxu1 %v677_v2 }
 0x171   :  { %1011 = vmatprep.mubr.f32.mxu1 %v680_v62 }
 0x174   :  { %1012 = vmatmul.mubr.f32.gmra.mxu1 %v679_v3 }
 0x175   :  { %1016 = vmatprep.mubr.f32.mxu1 %v682_v4 }
 0x178   :  { %1017 = vmatmul.mubr.f32.gmra.mxu1 %v681_v0  ;;  %v1191_v0 = vlaneseq }
 0x179   :  { %1021 = vmatprep.mubr.f32.mxu1 %v684_v5 }
 0x17c   :  { %1022 = vmatmul.mubr.f32.gmra.mxu1 %v683_v6 }
 0x17d   :  { %1026 = vmatprep.mubr.f32.mxu1 %v686_v7  ;;  %v2255_v7 = vshrl.u32 %v1191_v0, 7 }
 0x17f   :  { %2334 = vst [vmem:[#allocation9_spill] sm:$0xff] %v2255_v7 }
 0x180   :  { %1027 = vmatmul.mubr.f32.gmra.mxu1 %v685_v59 }
 0x181   :  { %1031 = vmatprep.mubr.f32.mxu1 %v688_v8  ;;  %v2260_v8 = vld [vmem:[%s2326_s5] sm:$0x3]  ;;  %s1531_s5 = smov [#allocation3]  }
 0x182   :  { %2335 = vst [vmem:[#allocation10_spill] sm:$0xff] %v2260_v8  ;;  %s1283_s13 = sshll.u32 %s1531_s5, 4  ;;  %s1284_s13 = int_to_ptr.vmem [resolvable:$true] %s1283_s13 }
 0x183   :  { %s1507_s14 = scalar_lea.vmem %s1284_s13, 16  ;;  %s1511_s15 = scalar_lea.vmem %s1284_s13, 32 }
 0x184   :  { %1032 = vmatmul.mubr.f32.gmra.mxu1 %v687_v9  ;;  %p1508_p0 = scmp.ne.s32.totalorder %s1284_s13, %s1507_s14  ;;  %p1512_p1 = scmp.lt.s32.totalorder %s1284_s13, %s1284_s13 }
 0x185   :  { %1036 = vmatprep.mubr.f32.mxu1 %v690_v10  ;;  %v1202_v10 = vsub.s32 1, %v2255_v7  ;;  %p1513_p2 = scmp.lt.s32.totalorder %s1511_s15, %s1507_s14 }
 0x187   :  { %p1514_p3 = por %p1513_p2, %p1512_p1 }
 0x188   :  { %1037 = vmatmul.mubr.f32.gmra.mxu1 %v689_v60 }
 0x189   :  { %1041 = vmatprep.mubr.f32.mxu1 %v692_v11  ;;  %v1203_v11 = vrot.slane %v2260_v8, %v1202_v10  ;;  %p1515_p4 = pnand %p1514_p3, %p1508_p0 }
 0x18b   :  { %1270 = vmatprep.mubr.f32.mxu0 %v1203_v11 }
 0x18c   :  { %1042 = vmatmul.mubr.f32.gmra.mxu1 %v691_v55 }
 0x18d   :  { %1046 = vmatprep.mubr.f32.mxu1 %v694_v12 }
 0x190   :  { %1047 = vmatmul.mubr.f32.gmra.mxu1 %v693_v13 }
 0x191   :  { %1051 = vmatprep.mubr.f32.mxu1 %v696_v14 }
 0x194   :  { %1052 = vmatmul.mubr.f32.gmra.mxu1 %v695_v15 }
 0x195   :  { %1056 = vmatprep.mubr.f32.mxu1 %v698_v57 }
 0x198   :  { %1057 = vmatmul.mubr.f32.gmra.mxu1 %v697_v16 }
 0x199   :  { %1061 = vmatprep.mubr.f32.mxu1 %v700_v17 }
 0x19c   :  { %1062 = vmatmul.mubr.f32.gmra.mxu1 %v699_v18 }
 0x19d   :  { %1066 = vmatprep.mubr.f32.mxu1 %v702_v19 }
 0x1a0   :  { %1067 = vmatmul.mubr.f32.gmra.mxu1 %v701_v20 }
 0x1a1   :  { %1071 = vmatprep.mubr.f32.mxu1 %v704_v21 }
 0x1a4   :  { %1072 = vmatmul.mubr.f32.gmra.mxu1 %v703_v23 }
 0x1a5   :  { %1076 = vmatprep.mubr.f32.mxu1 %v706_v24 }
 0x1a8   :  { %1077 = vmatmul.mubr.f32.gmra.mxu1 %v705_v25 }
 0x1a9   :  { %1081 = vmatprep.mubr.f32.mxu1 %v708_v27  ;;  %v925_v27 = vpop.permute.xlu0 %924 }
 0x1ac   :  { %1082 = vmatmul.mubr.f32.gmra.mxu1 %v707_v28 }
 0x1ad   :  { %1086 = vmatprep.mubr.f32.mxu1 %v710_v30  ;;  %v845_v30 = vpop.permute.xlu1 %844 }
 0x1b0   :  { %1087 = vmatmul.mubr.f32.gmra.mxu1 %v709_v31 }
 0x1b1   :  { %1091 = vmatprep.mubr.f32.mxu1 %v712_v32 }
 0x1b4   :  { %1092 = vmatmul.mubr.f32.gmra.mxu1 %v711_v34  ;;  %v920_v34 = vpop.permute.xlu0 %919 }
 0x1b5   :  { %1096 = vmatprep.mubr.f32.mxu1 %v714_v35 }
 0x1b8   :  { %1097 = vmatmul.mubr.f32.gmra.mxu1 %v713_v36  ;;  %v840_v36 = vpop.permute.xlu1 %839 }
 0x1b9   :  { %1101 = vmatprep.mubr.f32.mxu1 %v716_v38 }
 0x1bc   :  { %1102 = vmatmul.mubr.f32.gmra.mxu1 %v715_v39 }
 0x1bd   :  { %1106 = vmatprep.mubr.f32.mxu1 %v718_v41  ;;  %v915_v41 = vpop.permute.xlu0 %914 }
 0x1c0   :  { %1107 = vmatmul.mubr.f32.gmra.mxu1 %v717_v42 }
 0x1c1   :  { %1111 = vmatprep.mubr.f32.mxu1 %v720_v43  ;;  %v835_v43 = vpop.permute.xlu1 %834 }
 0x1c4   :  { %1112 = vmatmul.mubr.f32.gmra.mxu1 %v719_v45 }
 0x1c5   :  { %1116 = vmatprep.mubr.f32.mxu1 %v722_v44 }
 0x1c8   :  { %1117 = vmatmul.mubr.f32.gmra.mxu1 %v721_v46  ;;  %v910_v46 = vpop.permute.xlu0 %909 }
 0x1c9   :  { %1121 = vmatprep.mubr.f32.mxu1 %v724_v47 }
 0x1cc   :  { %1122 = vmatmul.mubr.f32.gmra.mxu1 %v723_v48  ;;  %v830_v48 = vpop.permute.xlu1 %829 }
 0x1cd   :  { %1126 = vmatprep.mubr.f32.mxu1 %v726_v49 }
 0x1d0   :  { %1127 = vmatmul.mubr.f32.gmra.mxu1 %v725_v37 }
 0x1d1   :  { %1131 = vmatprep.mubr.f32.mxu1 %v728_v50  ;;  %v905_v50 = vpop.permute.xlu0 %904 }
 0x1d4   :  { %1132 = vmatmul.mubr.f32.gmra.mxu1 %v727_v52 }
 0x1d5   :  { %1136 = vmatprep.mubr.f32.mxu1 %v730_v40  ;;  %v825_v40 = vpop.permute.xlu1 %824 }
 0x1d8   :  { %1137 = vmatmul.mubr.f32.gmra.mxu1 %v729_v53 }
 0x1d9   :  { %1141 = vmatprep.mubr.f32.mxu1 %v732_v54 }
 0x1dc   :  { %1142 = vmatmul.mubr.f32.gmra.mxu1 %v731_v29  ;;  %v900_v29 = vpop.permute.xlu0 %899 }
 0x1dd   :  { %1146 = vmatprep.mubr.f32.mxu1 %v734_v56 }
 0x1e0   :  { %1147 = vmatmul.mubr.f32.gmra.mxu1 %v733_v58  ;;  %v820_v58 = vpop.permute.xlu1 %819 }
 0x224   :  { %v2241_v33 = vpop.f32.mrf.mxu1 }
 0x225   :  { %2331 = vst [vmem:[#allocation6_spill] sm:$0xff] %v2241_v33 }
 0x226   :  { %v995_v22 = vpop.f32.mrf.mxu1 }
 0x228   :  { %v2243_v26 = vpop.f32.mrf.mxu1 }
 0x229   :  { %2332 = vst [vmem:[#allocation7_spill] sm:$0xff] %v2243_v26 }
 0x22a   :  { %v1000_v61 = vpop.f32.mrf.mxu1 }
 0x22c   :  { %v2245_v63 = vpop.f32.mrf.mxu1 }
 0x22d   :  { %2333 = vst [vmem:[#allocation8_spill] sm:$0xff] %v2245_v63 }
 0x22e   :  { %v1005_v51 = vpop.f32.mrf.mxu1 }
 0x22f   :  { %v895_v51 = vpop.permute.xlu0 %894 }
 0x230   :  { %v2247_v1 = vpop.f32.mrf.mxu1 }
 0x232   :  { %v1010_v2 = vpop.f32.mrf.mxu1 }
 0x234   :  { %v2249_v62 = vpop.f32.mrf.mxu1 }
 0x236   :  { %v1015_v3 = vpop.f32.mrf.mxu1 }
 0x237   :  { %v815_v3 = vpop.permute.xlu1 %814 }
 0x238   :  { %v2251_v4 = vpop.f32.mrf.mxu1 }
 0x23a   :  { %v1020_v5 = vpop.f32.mrf.mxu1 }
 0x23c   :  { %v2253_v6 = vpop.f32.mrf.mxu1 }
 0x23e   :  { %v1025_v59 = vpop.f32.mrf.mxu1 }
 0x23f   :  { %v890_v59 = vpop.permute.xlu0 %889 }
 0x240   :  { %v2262_v9 = vpop.f32.mrf.mxu1 }
 0x242   :  { %v1030_v60 = vpop.f32.mrf.mxu1 }
 0x243   :  { %v810_v60 = vpop.permute.xlu1 %809 }
 0x244   :  { %v2266_v55 = vpop.f32.mrf.mxu1 }
 0x246   :  { %v1035_v12 = vpop.f32.mrf.mxu1 }
 0x248   :  { %v2268_v13 = vpop.f32.mrf.mxu1 }
 0x24a   :  { %v1040_v14 = vpop.f32.mrf.mxu1 }
 0x24b   :  { %v885_v14 = vpop.permute.xlu0 %884 }
 0x24c   :  { %v2270_v15 = vpop.f32.mrf.mxu1 }
 0x24e   :  { %v1045_v57 = vpop.f32.mrf.mxu1 }
 0x250   :  { %v2272_v16 = vpop.f32.mrf.mxu1 }
 0x252   :  { %v1050_v17 = vpop.f32.mrf.mxu1 }
 0x253   :  { %v805_v17 = vpop.permute.xlu1 %804 }
 0x254   :  { %v2274_v18 = vpop.f32.mrf.mxu1 }
 0x256   :  { %v1055_v19 = vpop.f32.mrf.mxu1 }
 0x258   :  { %v2276_v20 = vpop.f32.mrf.mxu1 }
 0x25a   :  { %v1060_v21 = vpop.f32.mrf.mxu1 }
 0x25c   :  { %v1063_v23 = vpop.f32.mrf.mxu1 }
 0x25d   :  { %v1064_v8 = vadd.f32 %v1063_v23, %v840_v36  ;;  %v1049_v23 = vadd.f32 %v2272_v16, %v825_v40  ;;  %v1029_v40 = vadd.f32 %v2262_v9, %v805_v17 }
 0x25e   :  { %v1065_v24 = vpop.f32.mrf.mxu1 }
 0x25f   :  { %v880_v24 = vpop.permute.xlu0 %879 }
 0x260   :  { %v1068_v25 = vpop.f32.mrf.mxu1 }
 0x262   :  { %v1070_v28 = vpop.f32.mrf.mxu1 }
 0x264   :  { %v2278_v31 = vpop.f32.mrf.mxu1 }
 0x265   :  { %2336 = vst [vmem:[#allocation11_spill] sm:$0xff] %v2278_v31  ;;  %v1059_v31 = vadd.f32 %v2276_v20, %v835_v43 }
 0x266   :  { %v1075_v32 = vpop.f32.mrf.mxu1 }
 0x267   :  { %v800_v32 = vpop.permute.xlu1 %799 }
 0x268   :  { %v2280_v35 = vpop.f32.mrf.mxu1 }
 0x269   :  { %2337 = vst [vmem:[#allocation12_spill] sm:$0xff] %v2280_v35 }
 0x26a   :  { %v1080_v38 = vpop.f32.mrf.mxu1 }
 0x26c   :  { %v2282_v39 = vpop.f32.mrf.mxu1 }
 0x26e   :  { %v1085_v42 = vpop.f32.mrf.mxu1 }
 0x270   :  { %v2284_v45 = vpop.f32.mrf.mxu1 }
 0x272   :  { %v1090_v44 = vpop.f32.mrf.mxu1 }
 0x273   :  { %v875_v44 = vpop.permute.xlu0 %874 }
 0x274   :  { %v2286_v47 = vpop.f32.mrf.mxu1 }
 0x276   :  { %v1095_v49 = vpop.f32.mrf.mxu1 }
 0x278   :  { %v2288_v37 = vpop.f32.mrf.mxu1 }
 0x27a   :  { %v1100_v52 = vpop.f32.mrf.mxu1 }
 0x27b   :  { %v795_v52 = vpop.permute.xlu1 %794 }
 0x27c   :  { %v2290_v53 = vpop.f32.mrf.mxu1 }
 0x27e   :  { %v1105_v54 = vpop.f32.mrf.mxu1 }
 0x27f   :  { %v1069_v54 = vadd.f32 %v1068_v25, %v845_v30  ;;  %v790_v26 = vpop.permute.xlu1 %789 }
 0x280   :  { %v2292_v56 = vpop.f32.mrf.mxu1 }
 0x282   :  { %v1110_v22 = vpop.f32.mrf.mxu1 }
 0x284   :  { %v1113_v61 = vpop.f32.mrf.mxu1 }
 0x286   :  { %v1115_v2 = vpop.f32.mrf.mxu1 }
 0x288   :  { %v1118_v0 = vpop.f32.mrf.mxu1 }
 0x28a   :  { %v1120_v5 = vpop.f32.mrf.mxu1 }
 0x28c   :  { %v1123_v10 = vpop.f32.mrf.mxu1 }
 0x28e   :  { %v1125_v11 = vpop.f32.mrf.mxu1 }
 0x290   :  { %v1128_v12 = vpop.f32.mrf.mxu1 }
 0x291   :  { %v1129_v25 = vadd.f32 %v1128_v12, %v905_v50 }
 0x292   :  { %v1130_v57 = vpop.f32.mrf.mxu1 }
 0x293   :  { %v870_v57 = vpop.permute.xlu0 %869 }
 0x294   :  { %v1133_v19 = vpop.f32.mrf.mxu1  ;;  %v1094_v9 = vadd.f32 %v2286_v47, %v870_v57  ;;  %v2338_v47 = vld [vmem:[#allocation8_spill] sm:$0xff] }
 0x295   :  { %v1134_v35 = vadd.f32 %v1133_v19, %v910_v46  ;;  %v1119_v46 = vadd.f32 %v1118_v0, %v895_v51 }
 0x296   :  { %v1135_v21 = vpop.f32.mrf.mxu1 }
 0x297   :  { %v1167_v21 = vmax.f32 %v1069_v54, 0.0  ;;  %v1180_v36 = vmax.f32 %v1134_v35, 0.0  ;;  %v865_v20 = vpop.permute.xlu0 %864 }
 0x298   :  { %v1138_v28 = vpop.f32.mrf.mxu1 }
 0x299   :  { %v1139_v7 = vadd.f32 %v1138_v28, %v915_v41  ;;  %v1044_v41 = vadd.f32 %v2270_v15, %v820_v58  ;;  %v1177_v15 = vmax.f32 %v1119_v46, 0.0 }
 0x29a   :  { %v1140_v38 = vpop.f32.mrf.mxu1 }
 0x29b   :  { %v1054_v38 = vadd.f32 %v2274_v18, %v830_v48  ;;  %v1181_v30 = vmax.f32 %v1139_v7, 0.0  ;;  %v1179_v18 = vmax.f32 %v1129_v25, 0.0  ;;  %v1163_v7 = vmax.f32 %v1049_v23, 0.0  ;;  %v860_v50 = vpop.permute.xlu0 %859 }
 0x29c   :  { %v1143_v42 = vpop.f32.mrf.mxu1  ;;  %v1162_v35 = vmax.f32 %v1044_v41, 0.0  ;;  %v1109_v48 = vadd.f32 %v2292_v56, %v885_v14  ;;  %v1019_v56 = vadd.f32 %v2251_v4, %v795_v52  ;;  %v1089_v14 = vadd.f32 %v2284_v45, %v865_v20  ;;  %v2340_v45 = vld [vmem:[#allocation7_spill] sm:$0xff] }
 0x29d   :  { %v1144_v2 = vadd.f32 %v1143_v42, %v920_v34  ;;  %v1124_v34 = vadd.f32 %v1123_v10, %v900_v29  ;;  %v1164_v43 = vmax.f32 %v1054_v38, 0.0  ;;  %v1084_v4 = vadd.f32 %v2282_v39, %v860_v50  ;;  %v2342_v39 = vld [vmem:[#allocation6_spill] sm:$0xff] }
 0x29e   :  { %v1145_v49 = vpop.f32.mrf.mxu1  ;;  %v1175_v0 = vmax.f32 %v1109_v48, 0.0  ;;  %v1157_v19 = vmax.f32 %v1019_v56, 0.0  ;;  %v1171_v42 = vmax.f32 %v1089_v14, 0.0 }
 0x29f   :  { %v1182_v63 = vmax.f32 %v1144_v2, 0.0  ;;  %v1166_v49 = vmax.f32 %v1064_v8, 0.0  ;;  %v1039_v8 = vadd.f32 %v2268_v13, %v815_v3  ;;  %v1178_v16 = vmax.f32 %v1124_v34, 0.0 }
 0x2a0   :  { %v1148_v22 = vpop.f32.mrf.mxu1  ;;  %v1104_v13 = vadd.f32 %v2290_v53, %v880_v24  ;;  %v1014_v53 = vadd.f32 %v2249_v62, %v790_v26  ;;  %v1172_v24 = vmax.f32 %v1094_v9, 0.0  ;;  %v2339_v26 = vld [vmem:[#allocation12_spill] sm:$0xff] }
 0x2a1   :  { %v1149_v5 = vadd.f32 %v1148_v22, %v925_v27  ;;  %v1165_v27 = vmax.f32 %v1059_v31, 0.0  ;;  %v1034_v31 = vadd.f32 %v2266_v55, %v810_v60  ;;  %v1161_v29 = vmax.f32 %v1039_v8, 0.0  ;;  %v855_v60 = vpop.permute.xlu0 %854  ;;  %v2341_v22 = vld [vmem:[#allocation11_spill] sm:$0xff] }
 0x2a2   :  { %v1150_v11 = vpop.f32.mrf.mxu1  ;;  %v1099_v55 = vadd.f32 %v2288_v37, %v875_v44  ;;  %v1174_v10 = vmax.f32 %v1104_v13, 0.0  ;;  %v1079_v62 = vadd.f32 %v2339_v26, %v855_v60 }
 0x2a3   :  { %v1183_v33 = vmax.f32 %v1149_v5, 0.0  ;;  %v1160_v3 = vmax.f32 %v1034_v31, 0.0  ;;  %v1170_v5 = vmax.f32 %v1084_v4, 0.0 }
 0x2a4   :  { %v1173_v17 = vmax.f32 %v1099_v55, 0.0 }
 0x2a5   :  { %1387 = vmatprep.subr.mxu0 %v1183_v33  ;;  %v785_v33 = vpop.permute.xlu1 %784  ;;  %v850_v44 = vpop.permute.xlu0 %849 }
 0x2a6   :  { %1388 = vmatpush3.msra.mxu0 %v1167_v21  ;;  %v1009_v37 = vadd.f32 %v2247_v1, %v785_v33  ;;  %v1074_v2 = vadd.f32 %v2341_v22, %v850_v44  ;;  %v2343_v21 = vld [vmem:[#allocation9_spill] sm:$0xff] }
 0x2a7   :  { %1389 = vmatprep.subr.mxu0 %v1182_v63  ;;  %v1114_v63 = vadd.f32 %v1113_v61, %v890_v59  ;;  %v1024_v61 = vadd.f32 %v2253_v6, %v800_v32  ;;  %v1159_v59 = vmax.f32 %v1029_v40, 0.0  ;;  %v1156_v32 = vmax.f32 %v1014_v53, 0.0 }
 0x2a8   :  { %1390 = vmatpush3.msra.mxu0 %v1166_v49  ;;  %v1155_v54 = vmax.f32 %v1009_v37, 0.0  ;;  %v1193_v38 = vsub.s32 0, %v2343_v21  ;;  %v1169_v49 = vmax.f32 %v1079_v62, 0.0 }
 0x2a9   :  { %1391 = vmatprep.subr.mxu0 %v1181_v30  ;;  %v780_v58 = vpop.permute.xlu1 %779  ;;  %v1176_v51 = vmax.f32 %v1114_v63, 0.0  ;;  %v1158_v12 = vmax.f32 %v1024_v61, 0.0  ;;  %v2344_v30 = vld [vmem:[#allocation10_spill] sm:$0xff] }
 0x2aa   :  { %1392 = vmatpush3.msra.mxu0 %v1165_v27  ;;  %v1004_v28 = vadd.f32 %v2338_v47, %v780_v58  ;;  %v1199_v23 = vrot.slane %v2344_v30, %v1193_v38  ;;  %v1168_v27 = vmax.f32 %v1074_v2, 0.0 }
 0x2ab   :  { %1393 = vmatprep.subr.mxu0 %v1180_v36  ;;  %v1189_v36 = vpop.permute.xlu0 %1188 }
 0x2ac   :  { %1394 = vmatpush3.msra.mxu0 %v1164_v43  ;;  %v1154_v57 = vmax.f32 %v1004_v28, 0.0  ;;  %v1194_v43 = vrot.slane %v1189_v36, %v1193_v38 }
 0x2ad   :  { %1395 = vmatprep.subr.mxu0 %v1179_v18  ;;  %v775_v6 = vpop.permute.xlu1 %774 }
 0x2ae   :  { %1396 = vmatpush3.msra.mxu0 %v1163_v7  ;;  %v999_v52 = vadd.f32 %v2340_v45, %v775_v6 }
 0x2af   :  { %1397 = vmatprep.subr.mxu0 %v1178_v16 }
 0x2b0   :  { %1398 = vmatpush3.msra.mxu0 %v1162_v35  ;;  %v1153_v25 = vmax.f32 %v999_v52, 0.0 }
 0x2b1   :  { %1399 = vmatprep.subr.mxu0 %v1177_v15  ;;  %v770_v1 = vpop.permute.xlu1 %769 }
 0x2b2   :  { %1400 = vmatpush3.msra.mxu0 %v1161_v29  ;;  %v994_v11 = vadd.f32 %v2342_v39, %v770_v1 }
 0x2b3   :  { %1401 = vmatprep.subr.mxu0 %v1176_v51 }
 0x2b4   :  { %1402 = vmatpush3.msra.mxu0 %v1160_v3  ;;  %v1152_v34 = vmax.f32 %v994_v11, 0.0 }
 0x2b5   :  { %1403 = vmatprep.subr.mxu0 %v1175_v0 }
 0x2b6   :  { %1404 = vmatpush3.msra.mxu0 %v1159_v59 }
 0x2b7   :  { %1405 = vmatprep.subr.mxu0 %v1174_v10 }
 0x2b8   :  { %1406 = vmatpush3.msra.mxu0 %v1158_v12 }
 0x2b9   :  { %1407 = vmatprep.subr.mxu0 %v1173_v17 }
 0x2ba   :  { %1408 = vmatpush3.msra.mxu0 %v1157_v19 }
 0x2bb   :  { %1409 = vmatprep.subr.mxu0 %v1172_v24 }
 0x2bc   :  { %1410 = vmatpush3.msra.mxu0 %v1156_v32 }
 0x2bd   :  { %1411 = vmatprep.subr.mxu0 %v1171_v42 }
 0x2be   :  { %1412 = vmatpush3.msra.mxu0 %v1155_v54 }
 0x2bf   :  { %1413 = vmatprep.subr.mxu0 %v1170_v5 }
 0x2c0   :  { %1414 = vmatpush3.msra.mxu0 %v1154_v57 }
 0x2c1   :  { %1415 = vmatprep.subr.mxu0 %v1169_v49 }
 0x2c2   :  { %1416 = vmatpush3.msra.mxu0 %v1153_v25 }
 0x2c3   :  { %1417 = vmatprep.subr.mxu0 %v1168_v27 }
 0x2c4   :  { %1418 = vmatpush3.msra.mxu0 %v1152_v34 }
 0x2c5   :  { %1271 = vmatmul.mubr.f32.vlgmr.msra.gmra.mxu0 %v1199_v23 }
 0x385   :  { %v1419_v20 = vpop.f32.mrf.mxu0 }
 0x387   :  { %v1420_v41 = vpop.f32.mrf.mxu0 }
 0x388   :  { %v1421_v33 = vadd.f32 %v1420_v41, %v1419_v20 }
 0x38a   :  { %v1273_v46 = vadd.f32 %v1421_v33, %v1194_v43 }
 0x38c   :  { %1276 = vst [vmem:[#allocation3] sm:$0x1] %v1273_v46 }
 0x38d   :  { %1518 = shalt.err (!%p1515_p4)
}
 0x38e   :  { %1286 = dma.vmem_to_hbm [thread:$0]  %s1284_s13, 16, %s2328_s7, [#allocation4]  }
 0x38f   :  { %1527 = dma.done.wait [#allocation4], 16  }
 0x390   :  { %1528 = vsyncadd [#allocation4], 4294967280 }
 0x391   :  { %1290 = vsyncpa [#allocation4], 1 }

</bundles_post_ra>
